<compile_context>
chip_gen: v6e
topology: v6e:2x2x1
jax: 0.10.0
libtpu: 0.0.40
codegen_flags: <defaults>
</compile_context>

<pallas_src>
import functools

import jax
import jax.numpy as jnp
from jax.experimental import pallas as pl
from jax.experimental.pallas import tpu as pltpu

_LANE = 128
_SUBLANE = 8
_NEG_MASKED = -1000000000.0   # exact torch masked_fill value
_NEG_PADDED = -1e30           # strictly more negative; padded key columns

# Cached answer to "does this JAX accept BlockSpec(pipeline_mode=pl.Buffered(1))?"
_SINGLE_BUFFER_OK = [None]


def _round_up(x, m):
    return ((x + m - 1) // m) * m


@functools.lru_cache(maxsize=None)
def _tpu_config():
    """Returns (tq_cap, vmem_budget_bytes, vmem_limit_bytes, n_cores)."""
    try:
        kind = jax.devices()[0].device_kind.lower()
    except Exception:
        kind = ""
    vmem_cap = None
    try:
        info = pltpu.get_tpu_info()
        for attr in ("vmem_capacity_bytes", "vmem_bytes", "vmem_size_bytes"):
            val = getattr(info, attr, None)
            if val:
                vmem_cap = int(val)
                break
    except Exception:
        vmem_cap = None
    if vmem_cap is None:
        # v5e / v6e: 128 MiB physical VMEM; assume 64 MiB (v7x) otherwise.
        vmem_cap = (128 if ("v5" in kind or "v6" in kind) else 64) * 1024 * 1024
    vmem_budget = (vmem_cap * 5) // 8   # tile-selection budget (~62% physical)
    vmem_limit = (vmem_cap * 3) // 4    # scoped-VMEM limit for Mosaic (~75%)
    # v6e / v7x MXUs are 256x256 -> TQ up to 256; v5e (128x128) keeps 128.
    tq_cap = 256 if (("v6" in kind) or ("7" in kind)) else 128
    n_cores = 2 if "7" in kind else 1   # v7x: 2 TensorCores per chip
    return tq_cap, vmem_budget, vmem_limit, n_cores


def _attn_kernel(*refs, inv_temperature, has_bias, return_attn, mxu_dtype,
                 exact_softmax):
    """One (TB, TQ) tile of hypergraph scaled dot-product attention.

    refs = (q, k, v[, bias], out[, attn])
      q    : (TB, TQ, D)        native dtype
      k    : (TB, Lk_p, D)      native dtype (VMEM-resident across q-tiles)
      v    : (TB, Lk_p, Dv_p)   native dtype (VMEM-resident across q-tiles)
      bias : (TB|1, TQ|1, Lk_p) bf16 additive bias         (only if has_bias)
      out  : (TB, TQ, Dv_p)
      attn : (TB, TQ, Lk_p)                                (only if return_attn)
    """
    i = 0
    q_ref = refs[i]; i += 1
    k_ref = refs[i]; i += 1
    v_ref = refs[i]; i += 1
    bias_ref = None
    if has_bias:
        bias_ref = refs[i]; i += 1
    out_ref = refs[i]; i += 1
    attn_ref = refs[i] if return_attn else None

    q = q_ref[...] * inv_temperature              # scale in native dtype
    k = k_ref[...]
    if mxu_dtype is not None and q.dtype != mxu_dtype:
        q = q.astype(mxu_dtype)                   # feed the MXU in bf16
        k = k.astype(mxu_dtype)

    # (TB, TQ, Lk_p) scores with f32 accumulation on the MXU.
    scores = jnp.einsum("bqd,bkd->bqk", q, k,
                        preferred_element_type=jnp.float32)
    if has_bias:
        # Additive bias: 0 kept / -1e9 masked (torch masked_fill value) /
        # -1e30 padded key columns.  Single VALU add per score element.
        # NOTE: rows that are *fully* masked follow additive-bias semantics
        # (softmax of raw scores) instead of torch's exact uniform row.
        scores = scores + bias_ref[...].astype(jnp.float32)

    # Softmax in f32; exp and (approx) reciprocal run on the EUP.
    row_max = jnp.max(scores, axis=-1, keepdims=True)
    e = jnp.exp(scores - row_max)
    denom = jnp.sum(e, axis=-1, keepdims=True)
    if exact_softmax:
        attn = e / denom
    else:
        attn = e * pl.reciprocal(denom, approx=True)

    # TODO(synk): F.dropout(p=0.1) from the PyTorch module is omitted
    # (eval-mode semantics; the torch RNG stream cannot be reproduced).

    v = v_ref[...]
    pv_dtype = mxu_dtype if mxu_dtype is not None else v.dtype
    out = jnp.einsum("bqk,bkv->bqv", attn.astype(pv_dtype), v.astype(pv_dtype),
                     preferred_element_type=jnp.float32)

    out_ref[...] = out.astype(out_ref.dtype)
    if return_attn:
        attn_ref[...] = attn.astype(attn_ref.dtype)


def _vmem_estimate(tb, tq, *, d, lk_p, dv_p, in_bytes, out_bytes, attn_bytes,
                   bias_rows, return_attn):
    """Conservative per-step VMEM estimate (assumes double-buffered inputs)."""
    per = 0
    per += 2 * tb * tq * d * in_bytes           # q
    per += 2 * tb * lk_p * d * in_bytes         # k
    per += 2 * tb * lk_p * dv_p * in_bytes      # v
    if bias_rows:
        per += 2 * tb * bias_rows * lk_p * 2    # bf16 bias
    per += 2 * tb * tq * dv_p * out_bytes       # out
    if return_attn:
        per += 2 * tb * tq * lk_p * attn_bytes  # attn writeback
    per += 3 * tb * tq * lk_p * 4               # f32 softmax temporaries
    return per


def scaled_dot_product_attention_hyper(q, k, v, mask=None, *, temperature,
                                       return_attn=True, attn_dtype=None,
                                       mxu_dtype=None, exact_softmax=False):
    """Pallas TPU implementation of ScaledDotProductAttention_hyper.forward.

    Returns (output, attn) like the PyTorch module, or only the output when
    return_attn=False.  attn_dtype / mxu_dtype=jnp.bfloat16 trade a little
    precision for HBM / MXU throughput.
    """
    B, Lq, D = q.shape
    Bk, Lk, Dk = k.shape
    Bv, Lkv, Dv = v.shape
    assert (Bk, Dk) == (B, D) and (Bv, Lkv) == (B, Lk)

    out_dtype = q.dtype
    attn_dtype = jnp.dtype(out_dtype if attn_dtype is None else attn_dtype)
    mxu_dt = None if mxu_dtype is None else jnp.dtype(mxu_dtype)

    tq_cap, vmem_budget, vmem_limit, n_cores = _tpu_config()

    Lk_p = _round_up(Lk, _LANE)      # lane-dense scores / attn stores
    Dv_p = _round_up(Dv, _LANE)      # lane-dense output stores

    # ---- mask -> additive bf16 bias --------------------------------------
    bias = None
    if mask is not None:
        m = jnp.asarray(mask)
        if m.ndim == 2:
            m = m[None]
        Bm, Mq, Mk = m.shape
        assert Mk == Lk and Bm in (1, B) and Mq in (1, Lq)
        bias = jnp.where(m == 0, _NEG_MASKED, 0.0).astype(jnp.bfloat16)
    elif Lk_p > Lk:
        bias = jnp.zeros((1, 1, Lk), jnp.bfloat16)   # pad-column bias only
    has_bias = bias is not None
    bias_full_q = has_bias and bias.shape[1] > 1

    # ---- tile selection ---------------------------------------------------
    TQ = min(tq_cap, _round_up(Lq, _SUBLANE))
    TB = max(1, min(B, 256 // TQ))
    if n_cores > 1 and B > 1:
        # Keep at least n_cores batch-blocks so every TensorCore gets work.
        TB = max(1, min(TB, -(-B // n_cores)))

    in_bytes = jnp.dtype(q.dtype).itemsize
    out_bytes = jnp.dtype(out_dtype).itemsize
    attn_bytes = attn_dtype.itemsize if return_attn else 0

    def fits(tb, tq):
        rows = tq if bias_full_q else (1 if has_bias else 0)
        return _vmem_estimate(tb, tq, d=D, lk_p=Lk_p, dv_p=Dv_p,
                              in_bytes=in_bytes, out_bytes=out_bytes,
                              attn_bytes=attn_bytes, bias_rows=rows,
                              return_attn=return_attn) <= vmem_budget

    while TB > 1 and not fits(TB, TQ):
        TB -= 1
    while TQ > _SUBLANE and not fits(TB, TQ):
        TQ = max(_SUBLANE, _round_up(TQ // 2, _SUBLANE))
    # TODO(synk): key sequences whose resident K/V exceed the VMEM budget would
    # need flash-style Lk tiling (online softmax) instead of shrinking TQ.

    Lq_p = _round_up(Lq, TQ)
    B_p = _round_up(B, TB)

    # ---- pad operands -----------------------------------------------------
    def _pad3(x, b, s, f):
        pads = ((0, b - x.shape[0]), (0, s - x.shape[1]), (0, f - x.shape[2]))
        return jnp.pad(x, pads) if any(p[1] for p in pads) else x

    q_p = _pad3(q, B_p, Lq_p, D)
    k_p = _pad3(k, B_p, Lk_p, D)
    v_p = _pad3(v, B_p, Lk_p, Dv_p)

    bias_p = None
    if has_bias:
        bB = B_p if bias.shape[0] > 1 else 1
        bQ = Lq_p if bias_full_q else 1
        pads = ((0, bB - bias.shape[0]), (0, bQ - bias.shape[1]),
                (0, Lk_p - bias.shape[2]))
        bias_p = (jnp.pad(bias, pads, constant_values=_NEG_PADDED)
                  if any(p[1] for p in pads) else bias)

    # ---- pallas_call ------------------------------------------------------
    kernel = functools.partial(
        _attn_kernel,
        inv_temperature=1.0 / float(temperature),
        has_bias=has_bias,
        return_attn=return_attn,
        mxu_dtype=mxu_dt,
        exact_softmax=exact_softmax,
    )

    grid = (B_p // TB, Lq_p // TQ)
    out_shape_o = jax.ShapeDtypeStruct((B_p, Lq_p, Dv_p), out_dtype)
    if return_attn:
        out_shapes = (out_shape_o,
                      jax.ShapeDtypeStruct((B_p, Lq_p, Lk_p), attn_dtype))
    else:
        out_shapes = out_shape_o

    def _launch(single_buffer_resident):
        # Inputs whose block index is constant along the inner (q-tile) axis
        # only need one pipeline buffer; the exposed DMA happens once per
        # batch-block and the saved VMEM feeds back into bigger tiles.
        res_pm = ({"pipeline_mode": pl.Buffered(1)}
                  if single_buffer_resident else {})
        in_specs = [
            pl.BlockSpec((TB, TQ, D), lambda b, qi: (b, qi, 0)),
            pl.BlockSpec((TB, Lk_p, D), lambda b, qi: (b, 0, 0), **res_pm),
            pl.BlockSpec((TB, Lk_p, Dv_p), lambda b, qi: (b, 0, 0), **res_pm),
        ]
        inputs = [q_p, k_p, v_p]
        if has_bias:
            inputs.append(bias_p)
            if bias_full_q:
                in_specs.append(
                    pl.BlockSpec((TB, TQ, Lk_p), lambda b, qi: (b, qi, 0)))
            elif bias_p.shape[0] > 1:
                in_specs.append(
                    pl.BlockSpec((TB, 1, Lk_p), lambda b, qi: (b, 0, 0),
                                 **res_pm))
            else:
                in_specs.append(
                    pl.BlockSpec((1, 1, Lk_p), lambda b, qi: (0, 0, 0),
                                 **res_pm))

        out_spec_o = pl.BlockSpec((TB, TQ, Dv_p), lambda b, qi: (b, qi, 0))
        if return_attn:
            out_specs = [out_spec_o,
                         pl.BlockSpec((TB, TQ, Lk_p), lambda b, qi: (b, qi, 0))]
        else:
            out_specs = out_spec_o

        return pl.pallas_call(
            kernel,
            out_shape=out_shapes,
            grid_spec=pltpu.PrefetchScalarGridSpec(
                num_scalar_prefetch=0,
                grid=grid,
                in_specs=in_specs,
                out_specs=out_specs,
            ),
            compiler_params=pltpu.CompilerParams(
                # Batch axis "parallel" (v7x shards it over its 2 TCs); q-tile
                # axis "arbitrary" so each core keeps its K/V re-DMA skip.
                dimension_semantics=("parallel", "arbitrary"),
                vmem_limit_bytes=int(vmem_limit),
            ),
        )(*inputs)

    if _SINGLE_BUFFER_OK[0] is False:
        result = _launch(False)
    else:
        try:
            result = _launch(True)
            _SINGLE_BUFFER_OK[0] = True
        except Exception:
            # pipeline_mode=pl.Buffered(1) unsupported in this JAX build (or a
            # genuine error, which _launch(False) will re-raise identically).
            _SINGLE_BUFFER_OK[0] = False
            result = _launch(False)

    if return_attn:
        out_p, attn_p = result
        return out_p[:B, :Lq, :Dv], attn_p[:B, :Lq, :Lk]
    return result[:B, :Lq, :Dv]


def _reference(q, k, v, mask, temperature):
    attn = jnp.einsum("bqd,bkd->bqk", q / temperature, k)
    if mask is not None:
        attn = jnp.where(mask == 0, _NEG_MASKED, attn)
    attn = jax.nn.softmax(attn, axis=-1)
    out = jnp.einsum("bqk,bkv->bqv", attn, v)
    return out, attn


if __name__ == "__main__":
    # ---- Test 1: small shapes consistent with the module ------------------
    B, Lq, Lk, D, Dv = 2, 8, 8, 32, 32
    temperature = D ** 0.5

    key = jax.random.PRNGKey(0)
    kq, kk, kv, km = jax.random.split(key, 4)
    q = jax.random.normal(kq, (B, Lq, D), dtype=jnp.float32)
    k = jax.random.normal(kk, (B, Lk, D), dtype=jnp.float32)
    v = jax.random.normal(kv, (B, Lk, Dv), dtype=jnp.float32)
    mask = (jax.random.uniform(km, (B, Lq, Lk)) > 0.2)
    mask = mask.at[..., 0].set(True)          # at least one valid key per row
    mask = mask.astype(jnp.int32)

    out, attn = scaled_dot_product_attention_hyper(q, k, v, mask,
                                                   temperature=temperature)
    jax.block_until_ready(out); jax.block_until_ready(attn)
    ref_out, ref_attn = _reference(q, k, v, mask, temperature)
    assert jnp.allclose(out, ref_out, atol=2e-3, rtol=2e-3)
    assert jnp.allclose(attn, ref_attn, atol=2e-3, rtol=2e-3)

    # mask=None path (specialized kernel: no bias input beyond pad columns)
    out_nm, attn_nm = scaled_dot_product_attention_hyper(q, k, v, None,
                                                         temperature=temperature)
    jax.block_until_ready(out_nm)
    ref_out_nm, ref_attn_nm = _reference(q, k, v, None, temperature)
    assert jnp.allclose(out_nm, ref_out_nm, atol=2e-3, rtol=2e-3)
    assert jnp.allclose(attn_nm, ref_attn_nm, atol=2e-3, rtol=2e-3)

    # return_attn=False path (drops the O(Lq*Lk) attn writeback)
    out_only = scaled_dot_product_attention_hyper(q, k, v, mask,
                                                  temperature=temperature,
                                                  return_attn=False)
    jax.block_until_ready(out_only)
    assert jnp.allclose(out_only, ref_out, atol=2e-3, rtol=2e-3)

    # key-padding mask (B, 1, Lk): not broadcast over Lq in HBM; exact softmax
    kp_mask = (jax.random.uniform(jax.random.PRNGKey(7), (B, 1, Lk)) > 0.3)
    kp_mask = kp_mask.at[..., 0].set(True).astype(jnp.int32)
    out_kp, attn_kp = scaled_dot_product_attention_hyper(
        q, k, v, kp_mask, temperature=temperature, exact_softmax=True)
    jax.block_until_ready(out_kp)
    r_out_kp, r_attn_kp = _reference(q, k, v, kp_mask, temperature)
    assert jnp.allclose(out_kp, r_out_kp, atol=2e-3, rtol=2e-3)
    assert jnp.allclose(attn_kp, r_attn_kp, atol=2e-3, rtol=2e-3)

    # ---- Test 2: ragged shapes exercising q-tiling / batching / padding ----
    B2, Lq2, Lk2, D2, Dv2 = 3, 300, 160, 64, 48
    t2 = D2 ** 0.5
    k2q, k2k, k2v, k2m = jax.random.split(jax.random.PRNGKey(1), 4)
    q2 = jax.random.normal(k2q, (B2, Lq2, D2), dtype=jnp.float32)
    k2 = jax.random.normal(k2k, (B2, Lk2, D2), dtype=jnp.float32)
    v2 = jax.random.normal(k2v, (B2, Lk2, Dv2), dtype=jnp.float32)
    m2 = (jax.random.uniform(k2m, (B2, Lq2, Lk2)) > 0.3)
    m2 = m2.at[..., 0].set(True).astype(jnp.int32)

    out2, attn2 = scaled_dot_product_attention_hyper(q2, k2, v2, m2,
                                                     temperature=t2)
    jax.block_until_ready(out2)
    r_out2, r_attn2 = _reference(q2, k2, v2, m2, t2)
    assert jnp.allclose(out2, r_out2, atol=2e-3, rtol=2e-3)
    assert jnp.allclose(attn2, r_attn2, atol=2e-3, rtol=2e-3)

    # ---- Test 3: bf16 MXU feeding + bf16 attn writeback (loose tolerance) --
    out3, attn3 = scaled_dot_product_attention_hyper(
        q2, k2, v2, m2, temperature=t2,
        mxu_dtype=jnp.bfloat16, attn_dtype=jnp.bfloat16)
    jax.block_until_ready(out3)
    assert jnp.allclose(out3, r_out2, atol=1e-1, rtol=1e-1)
    assert jnp.allclose(attn3.astype(jnp.float32), r_attn2, atol=5e-2, rtol=1e-1)

    print("KERNEL_OK")
</pallas_src>

<mosaic_0001>
module attributes {stable_mosaic.version = 11 : i64} {
  func.func @_attn_kernel(%arg0: i32, %arg1: i32, %arg2: memref<2x8x32xf32, #tpu.memory_space<vmem>>, %arg3: memref<2x128x32xf32, #tpu.memory_space<vmem>>, %arg4: memref<2x128x128xf32, #tpu.memory_space<vmem>>, %arg5: memref<2x8x128xbf16, #tpu.memory_space<vmem>>, %arg6: memref<2x8x128xf32, #tpu.memory_space<vmem>>, %arg7: memref<2x8x128xf32, #tpu.memory_space<vmem>>) attributes {dimension_semantics = [#tpu.dimension_semantics<parallel>, #tpu.dimension_semantics<arbitrary>], iteration_bounds = array<i64: 1, 1>, scalar_prefetch = 0 : i64, scratch_operands = 0 : i64, tpu.core_type = #tpu.core_type<tc>, window_params = [{transform_indices = @transform_0, window_bounds = array<i64: 2, 8, 32>}, {pipeline_mode = #tpu.pipeline_mode<synchronous>, transform_indices = @transform_1, window_bounds = array<i64: 2, 128, 32>}, {pipeline_mode = #tpu.pipeline_mode<synchronous>, transform_indices = @transform_2, window_bounds = array<i64: 2, 128, 128>}, {transform_indices = @transform_3, window_bounds = array<i64: 2, 8, 128>}, {transform_indices = @transform_4, window_bounds = array<i64: 2, 8, 128>}, {transform_indices = @transform_5, window_bounds = array<i64: 2, 8, 128>}]} {
    %c0 = arith.constant 0 : index
    %c0_0 = arith.constant 0 : index
    %c0_1 = arith.constant 0 : index
    %0 = vector.load %arg2[%c0, %c0_0, %c0_1] : memref<2x8x32xf32, #tpu.memory_space<vmem>>, vector<2x8x32xf32>
    %cst = arith.constant 0.176776692 : f32
    %1 = vector.broadcast %cst : f32 to vector<2x8x32xf32>
    %2 = arith.mulf %0, %1 : vector<2x8x32xf32>
    %c0_2 = arith.constant 0 : index
    %c0_3 = arith.constant 0 : index
    %c0_4 = arith.constant 0 : index
    %3 = vector.load %arg3[%c0_2, %c0_3, %c0_4] : memref<2x128x32xf32, #tpu.memory_space<vmem>>, vector<2x128x32xf32>
    "tpu.trace_start"() <{level = 10 : i32, message = "bqd,bkd->bqk"}> : () -> ()
    %cst_5 = arith.constant dense<0.000000e+00> : vector<2x8x128xf32>
    %4 = tpu.matmul %2, %3, %cst_5 {dimension_numbers = #tpu.dot_dimension_numbers<[2], [2], [1], [1], [0, 0, 0, 1, 1, 1], [0], [0]>} : vector<2x8x32xf32>, vector<2x128x32xf32>, vector<2x8x128xf32> -> vector<2x8x128xf32>
    "tpu.trace_stop"() : () -> ()
    %c0_6 = arith.constant 0 : index
    %c0_7 = arith.constant 0 : index
    %c0_8 = arith.constant 0 : index
    %5 = vector.load %arg5[%c0_6, %c0_7, %c0_8] : memref<2x8x128xbf16, #tpu.memory_space<vmem>>, vector<2x8x128xbf16>
    %6 = arith.extf %5 : vector<2x8x128xbf16> to vector<2x8x128xf32>
    %7 = arith.addf %4, %6 : vector<2x8x128xf32>
    %cst_9 = arith.constant dense<0xFF800000> : vector<2x8xf32>
    %8 = vector.multi_reduction <maximumf>, %7, %cst_9 [2] : vector<2x8x128xf32> to vector<2x8xf32>
    %9 = vector.shape_cast %8 : vector<2x8xf32> to vector<2x8x1xf32>
    %10 = vector.broadcast %9 : vector<2x8x1xf32> to vector<2x8x128xf32>
    %11 = arith.subf %7, %10 : vector<2x8x128xf32>
    %12 = math.exp %11 : vector<2x8x128xf32>
    %cst_10 = arith.constant dense<0.000000e+00> : vector<2x8xf32>
    %13 = vector.multi_reduction <add>, %12, %cst_10 [2] : vector<2x8x128xf32> to vector<2x8xf32>
    %14 = vector.shape_cast %13 : vector<2x8xf32> to vector<2x8x1xf32>
    %15 = tpu.reciprocal %14 {approx = true} : vector<2x8x1xf32> -> vector<2x8x1xf32>
    %16 = vector.broadcast %15 : vector<2x8x1xf32> to vector<2x8x128xf32>
    %17 = arith.mulf %12, %16 : vector<2x8x128xf32>
    %c0_11 = arith.constant 0 : index
    %c0_12 = arith.constant 0 : index
    %c0_13 = arith.constant 0 : index
    %18 = vector.load %arg4[%c0_11, %c0_12, %c0_13] : memref<2x128x128xf32, #tpu.memory_space<vmem>>, vector<2x128x128xf32>
    "tpu.trace_start"() <{level = 10 : i32, message = "bqk,bkv->bqv"}> : () -> ()
    %cst_14 = arith.constant dense<0.000000e+00> : vector<2x8x128xf32>
    %19 = tpu.matmul %17, %18, %cst_14 {dimension_numbers = #tpu.dot_dimension_numbers<[2], [1], [1], [2], [0, 0, 0, 1, 1, 2], [0], [0]>} : vector<2x8x128xf32>, vector<2x128x128xf32>, vector<2x8x128xf32> -> vector<2x8x128xf32>
    "tpu.trace_stop"() : () -> ()
    %c0_15 = arith.constant 0 : index
    %c0_16 = arith.constant 0 : index
    %c0_17 = arith.constant 0 : index
    %20 = vector.load %arg6[%c0_15, %c0_16, %c0_17] : memref<2x8x128xf32, #tpu.memory_space<vmem>>, vector<2x8x128xf32>
    tpu.vector_store %arg6[%c0_15, %c0_16, %c0_17], %19 {strides = array<i32>} : memref<2x8x128xf32, #tpu.memory_space<vmem>>, vector<2x8x128xf32>,
    %c0_18 = arith.constant 0 : index
    %c0_19 = arith.constant 0 : index
    %c0_20 = arith.constant 0 : index
    %21 = vector.load %arg7[%c0_18, %c0_19, %c0_20] : memref<2x8x128xf32, #tpu.memory_space<vmem>>, vector<2x8x128xf32>
    tpu.vector_store %arg7[%c0_18, %c0_19, %c0_20], %17 {strides = array<i32>} : memref<2x8x128xf32, #tpu.memory_space<vmem>>, vector<2x8x128xf32>,
    return
  }
  func.func @transform_0(%arg0: i32, %arg1: i32) -> (i32, i32, i32) {
    %c0_i32 = arith.constant 0 : i32
    %c0_i32_0 = arith.constant 0 : i32
    return %arg0, %arg1, %c0_i32 : i32, i32, i32
  }
  func.func @transform_1(%arg0: i32, %arg1: i32) -> (i32, i32, i32) {
    %c0_i32 = arith.constant 0 : i32
    %c0_i32_0 = arith.constant 0 : i32
    %c0_i32_1 = arith.constant 0 : i32
    return %arg0, %c0_i32, %c0_i32_0 : i32, i32, i32
  }
  func.func @transform_2(%arg0: i32, %arg1: i32) -> (i32, i32, i32) {
    %c0_i32 = arith.constant 0 : i32
    %c0_i32_0 = arith.constant 0 : i32
    %c0_i32_1 = arith.constant 0 : i32
    return %arg0, %c0_i32, %c0_i32_0 : i32, i32, i32
  }
  func.func @transform_3(%arg0: i32, %arg1: i32) -> (i32, i32, i32) {
    %c0_i32 = arith.constant 0 : i32
    %c0_i32_0 = arith.constant 0 : i32
    return %arg0, %arg1, %c0_i32 : i32, i32, i32
  }
  func.func @transform_4(%arg0: i32, %arg1: i32) -> (i32, i32, i32) {
    %c0_i32 = arith.constant 0 : i32
    %c0_i32_0 = arith.constant 0 : i32
    return %arg0, %arg1, %c0_i32 : i32, i32, i32
  }
  func.func @transform_5(%arg0: i32, %arg1: i32) -> (i32, i32, i32) {
    %c0_i32 = arith.constant 0 : i32
    %c0_i32_0 = arith.constant 0 : i32
    return %arg0, %arg1, %c0_i32 : i32, i32, i32
  }
}

module attributes {stable_mosaic.version = 11 : i64} {
  func.func @_attn_kernel(%arg0: i32, %arg1: i32, %arg2: memref<2x8x32xf32, #tpu.memory_space<vmem>>, %arg3: memref<2x128x32xf32, #tpu.memory_space<vmem>>, %arg4: memref<2x128x128xf32, #tpu.memory_space<vmem>>, %arg5: memref<2x8x128xbf16, #tpu.memory_space<vmem>>, %arg6: memref<2x8x128xf32, #tpu.memory_space<vmem>>, %arg7: memref<2x8x128xf32, #tpu.memory_space<vmem>>) attributes {dimension_semantics = [#tpu.dimension_semantics<parallel>, #tpu.dimension_semantics<arbitrary>], iteration_bounds = array<i64: 1, 1>, scalar_prefetch = 0 : i64, scratch_operands = 0 : i64, tpu.core_type = #tpu.core_type<tc>, window_params = [{transform_indices = @transform_0, window_bounds = array<i64: 2, 8, 32>}, {transform_indices = @transform_1, window_bounds = array<i64: 2, 128, 32>}, {transform_indices = @transform_2, window_bounds = array<i64: 2, 128, 128>}, {transform_indices = @transform_3, window_bounds = array<i64: 2, 8, 128>}, {transform_indices = @transform_4, window_bounds = array<i64: 2, 8, 128>}, {transform_indices = @transform_5, window_bounds = array<i64: 2, 8, 128>}]} {
    %c0 = arith.constant 0 : index
    %c0_0 = arith.constant 0 : index
    %c0_1 = arith.constant 0 : index
    %0 = vector.load %arg2[%c0, %c0_0, %c0_1] : memref<2x8x32xf32, #tpu.memory_space<vmem>>, vector<2x8x32xf32>
    %cst = arith.constant 0.176776692 : f32
    %1 = vector.broadcast %cst : f32 to vector<2x8x32xf32>
    %2 = arith.mulf %0, %1 : vector<2x8x32xf32>
    %c0_2 = arith.constant 0 : index
    %c0_3 = arith.constant 0 : index
    %c0_4 = arith.constant 0 : index
    %3 = vector.load %arg3[%c0_2, %c0_3, %c0_4] : memref<2x128x32xf32, #tpu.memory_space<vmem>>, vector<2x128x32xf32>
    "tpu.trace_start"() <{level = 10 : i32, message = "bqd,bkd->bqk"}> : () -> ()
    %cst_5 = arith.constant dense<0.000000e+00> : vector<2x8x128xf32>
    %4 = tpu.matmul %2, %3, %cst_5 {dimension_numbers = #tpu.dot_dimension_numbers<[2], [2], [1], [1], [0, 0, 0, 1, 1, 1], [0], [0]>} : vector<2x8x32xf32>, vector<2x128x32xf32>, vector<2x8x128xf32> -> vector<2x8x128xf32>
    "tpu.trace_stop"() : () -> ()
    %c0_6 = arith.constant 0 : index
    %c0_7 = arith.constant 0 : index
    %c0_8 = arith.constant 0 : index
    %5 = vector.load %arg5[%c0_6, %c0_7, %c0_8] : memref<2x8x128xbf16, #tpu.memory_space<vmem>>, vector<2x8x128xbf16>
    %6 = arith.extf %5 : vector<2x8x128xbf16> to vector<2x8x128xf32>
    %7 = arith.addf %4, %6 : vector<2x8x128xf32>
    %cst_9 = arith.constant dense<0xFF800000> : vector<2x8xf32>
    %8 = vector.multi_reduction <maximumf>, %7, %cst_9 [2] : vector<2x8x128xf32> to vector<2x8xf32>
    %9 = vector.shape_cast %8 : vector<2x8xf32> to vector<2x8x1xf32>
    %10 = vector.broadcast %9 : vector<2x8x1xf32> to vector<2x8x128xf32>
    %11 = arith.subf %7, %10 : vector<2x8x128xf32>
    %12 = math.exp %11 : vector<2x8x128xf32>
    %cst_10 = arith.constant dense<0.000000e+00> : vector<2x8xf32>
    %13 = vector.multi_reduction <add>, %12, %cst_10 [2] : vector<2x8x128xf32> to vector<2x8xf32>
    %14 = vector.shape_cast %13 : vector<2x8xf32> to vector<2x8x1xf32>
    %15 = tpu.reciprocal %14 {approx = true} : vector<2x8x1xf32> -> vector<2x8x1xf32>
    %16 = vector.broadcast %15 : vector<2x8x1xf32> to vector<2x8x128xf32>
    %17 = arith.mulf %12, %16 : vector<2x8x128xf32>
    %c0_11 = arith.constant 0 : index
    %c0_12 = arith.constant 0 : index
    %c0_13 = arith.constant 0 : index
    %18 = vector.load %arg4[%c0_11, %c0_12, %c0_13] : memref<2x128x128xf32, #tpu.memory_space<vmem>>, vector<2x128x128xf32>
    "tpu.trace_start"() <{level = 10 : i32, message = "bqk,bkv->bqv"}> : () -> ()
    %cst_14 = arith.constant dense<0.000000e+00> : vector<2x8x128xf32>
    %19 = tpu.matmul %17, %18, %cst_14 {dimension_numbers = #tpu.dot_dimension_numbers<[2], [1], [1], [2], [0, 0, 0, 1, 1, 2], [0], [0]>} : vector<2x8x128xf32>, vector<2x128x128xf32>, vector<2x8x128xf32> -> vector<2x8x128xf32>
    "tpu.trace_stop"() : () -> ()
    %c0_15 = arith.constant 0 : index
    %c0_16 = arith.constant 0 : index
    %c0_17 = arith.constant 0 : index
    %20 = vector.load %arg6[%c0_15, %c0_16, %c0_17] : memref<2x8x128xf32, #tpu.memory_space<vmem>>, vector<2x8x128xf32>
    tpu.vector_store %arg6[%c0_15, %c0_16, %c0_17], %19 {strides = array<i32>} : memref<2x8x128xf32, #tpu.memory_space<vmem>>, vector<2x8x128xf32>,
    %c0_18 = arith.constant 0 : index
    %c0_19 = arith.constant 0 : index
    %c0_20 = arith.constant 0 : index
    %21 = vector.load %arg7[%c0_18, %c0_19, %c0_20] : memref<2x8x128xf32, #tpu.memory_space<vmem>>, vector<2x8x128xf32>
    tpu.vector_store %arg7[%c0_18, %c0_19, %c0_20], %17 {strides = array<i32>} : memref<2x8x128xf32, #tpu.memory_space<vmem>>, vector<2x8x128xf32>,
    return
  }
  func.func @transform_0(%arg0: i32, %arg1: i32) -> (i32, i32, i32) {
    %c0_i32 = arith.constant 0 : i32
    %c0_i32_0 = arith.constant 0 : i32
    return %arg0, %arg1, %c0_i32 : i32, i32, i32
  }
  func.func @transform_1(%arg0: i32, %arg1: i32) -> (i32, i32, i32) {
    %c0_i32 = arith.constant 0 : i32
    %c0_i32_0 = arith.constant 0 : i32
    %c0_i32_1 = arith.constant 0 : i32
    return %arg0, %c0_i32, %c0_i32_0 : i32, i32, i32
  }
  func.func @transform_2(%arg0: i32, %arg1: i32) -> (i32, i32, i32) {
    %c0_i32 = arith.constant 0 : i32
    %c0_i32_0 = arith.constant 0 : i32
    %c0_i32_1 = arith.constant 0 : i32
    return %arg0, %c0_i32, %c0_i32_0 : i32, i32, i32
  }
  func.func @transform_3(%arg0: i32, %arg1: i32) -> (i32, i32, i32) {
    %c0_i32 = arith.constant 0 : i32
    %c0_i32_0 = arith.constant 0 : i32
    return %arg0, %arg1, %c0_i32 : i32, i32, i32
  }
  func.func @transform_4(%arg0: i32, %arg1: i32) -> (i32, i32, i32) {
    %c0_i32 = arith.constant 0 : i32
    %c0_i32_0 = arith.constant 0 : i32
    return %arg0, %arg1, %c0_i32 : i32, i32, i32
  }
  func.func @transform_5(%arg0: i32, %arg1: i32) -> (i32, i32, i32) {
    %c0_i32 = arith.constant 0 : i32
    %c0_i32_0 = arith.constant 0 : i32
    return %arg0, %arg1, %c0_i32 : i32, i32, i32
  }
}

</mosaic_0001>

<bundles_post_ra>
// kernel: tpu_custom_call.1
= control target key start
LH: loop header
LB: loop body
LE: loop exit
PB: predicated region body
PF: predicated region fallthrough
CT: control target
= control target key end

     0   :  { %11 = vsyncpa [#allocation3], 0  ;;  %vm61_vm0 = vcmask 261120   ;;  %v834_v2 = vmov 0.0   ;;  %vm835_vm1 = vmmov 0   ;;  %s1187_s0 = inlined_call_operand.vmem [shape: f32[2,8,32], index: 0, kind: input, shape index: {}]   ;;  %s1188_s1 = inlined_call_operand.vmem [shape: f32[2,128,32], index: 1, kind: input, shape index: {}]   ;;  %s1189_s2 = inlined_call_operand.vmem [shape: f32[2,128,128], index: 2, kind: input, shape index: {}]   ;;  %s1190_s3 = inlined_call_operand.vmem [shape: bf16[2,8,128], index: 3, kind: input, shape index: {}]   ;;  %s1191_s4 = inlined_call_operand.hbm [shape: f32[2,8,128], index: 4, kind: output, shape index: {0}]   ;;  %s1192_s5 = inlined_call_operand.hbm [shape: f32[2,8,128], index: 5, kind: output, shape index: {1}]  }
   0x1   :  { %v40_v0 = vld [vmem:[%s1188_s1 + $0x78] sm:$0xff]  ;;  %636 = vmatprep.subr.mxu0 %v834_v2  ;;  %671 = vmatprep.subr.mxu1 %v834_v2  ;;  %v39_v3 = vld [vmem:[%s1188_s1 + $0x70] sm:$0xff]  ;;  %v38_v5 = vld [vmem:[%s1188_s1 + $0x68] sm:$0xff] }
   0x2   :  { %v56_v1 = vld [vmem:[%s1188_s1 + $0xf8] sm:$0xff]  ;;  %637 = vmatpush3.xpose.msk.msra.mxu0 %vm61_vm0, %v40_v0  ;;  %v55_v4 = vld [vmem:[%s1188_s1 + $0xf0] sm:$0xff]  ;;  %668 = vmatprep.mubr.msk.f32.mxu0 %vm835_vm1, %v834_v2  ;;  %v54_v6 = vld [vmem:[%s1188_s1 + $0xe8] sm:$0xff] }
   0x3   :  { %672 = vmatpush3.xpose.msk.msra.mxu1 %vm61_vm0, %v56_v1  ;;  %638 = vmatprep.subr.mxu0 %v834_v2  ;;  %v37_v7 = vld [vmem:[%s1188_s1 + $0x60] sm:$0xff] }
   0x4   :  { %673 = vmatprep.subr.mxu1 %v834_v2  ;;  %703 = vmatprep.mubr.msk.f32.mxu1 %vm835_vm1, %v834_v2  ;;  %v53_v8 = vld [vmem:[%s1188_s1 + $0xe0] sm:$0xff] }
   0x6   :  { %639 = vmatpush3.xpose.msk.msra.mxu0 %vm61_vm0, %v39_v3 }
   0x7   :  { %674 = vmatpush3.xpose.msk.msra.mxu1 %vm61_vm0, %v55_v4  ;;  %640 = vmatprep.subr.mxu0 %v834_v2 }
   0x8   :  { %675 = vmatprep.subr.mxu1 %v834_v2 }
   0xa   :  { %641 = vmatpush3.xpose.msk.msra.mxu0 %vm61_vm0, %v38_v5 }
   0xb   :  { %676 = vmatpush3.xpose.msk.msra.mxu1 %vm61_vm0, %v54_v6  ;;  %642 = vmatprep.subr.mxu0 %v834_v2 }
   0xc   :  { %677 = vmatprep.subr.mxu1 %v834_v2 }
   0xd   :  { %12 = vsyncpa [#allocation5], 0  ;;  %v36_v9 = vld [vmem:[%s1188_s1 + $0x58] sm:$0xff]  ;;  %v35_v11 = vld [vmem:[%s1188_s1 + $0x50] sm:$0xff]  ;;  %s836_s18 = smov [#allocation4]  }
   0xe   :  { %643 = vmatpush3.xpose.msk.msra.mxu0 %vm61_vm0, %v37_v7  ;;  %v52_v10 = vld [vmem:[%s1188_s1 + $0xd8] sm:$0xff]  ;;  %v51_v12 = vld [vmem:[%s1188_s1 + $0xd0] sm:$0xff]  ;;  %v34_v13 = vld [vmem:[%s1188_s1 + $0x48] sm:$0xff]  ;;  %s515_s19 = sshll.u32 %s836_s18, 4  ;;  %s516_s19 = int_to_ptr.vmem [resolvable:$true] %s515_s19 }
   0xf   :  { %678 = vmatpush3.xpose.msk.msra.mxu1 %vm61_vm0, %v53_v8  ;;  %644 = vmatprep.subr.mxu0 %v834_v2  ;;  %v50_v14 = vld [vmem:[%s1188_s1 + $0xc8] sm:$0xff]  ;;  %v33_v15 = vld [vmem:[%s1188_s1 + $0x40] sm:$0xff]  ;;  %v32_v17 = vld [vmem:[%s1188_s1 + $0x38] sm:$0xff]  ;;  %p795_p1 = scmp.lt.s32.totalorder %s516_s19, %s516_s19 }
  0x10   :  { %679 = vmatprep.subr.mxu1 %v834_v2  ;;  %v49_v16 = vld [vmem:[%s1188_s1 + $0xc0] sm:$0xff]  ;;  %v48_v18 = vld [vmem:[%s1188_s1 + $0xb8] sm:$0xff]  ;;  %v31_v19 = vld [vmem:[%s1188_s1 + $0x30] sm:$0xff] }
  0x11   :  { %v47_v20 = vld [vmem:[%s1188_s1 + $0xb0] sm:$0xff]  ;;  %v30_v21 = vld [vmem:[%s1188_s1 + $0x28] sm:$0xff]  ;;  %v29_v23 = vld [vmem:[%s1188_s1 + $0x20] sm:$0xff] }
  0x12   :  { %645 = vmatpush3.xpose.msk.msra.mxu0 %vm61_vm0, %v36_v9  ;;  %v46_v22 = vld [vmem:[%s1188_s1 + $0xa8] sm:$0xff]  ;;  %v45_v24 = vld [vmem:[%s1188_s1 + $0xa0] sm:$0xff]  ;;  %v28_v25 = vld [vmem:[%s1188_s1 + $0x18] sm:$0xff] }
  0x13   :  { %680 = vmatpush3.xpose.msk.msra.mxu1 %vm61_vm0, %v52_v10  ;;  %646 = vmatprep.subr.mxu0 %v834_v2  ;;  %v44_v26 = vld [vmem:[%s1188_s1 + $0x98] sm:$0xff]  ;;  %v27_v27 = vld [vmem:[%s1188_s1 + $0x10] sm:$0xff]  ;;  %v26_v29 = vld [vmem:[%s1188_s1 + $0x8] sm:$0xff] }
  0x14   :  { %681 = vmatprep.subr.mxu1 %v834_v2  ;;  %v43_v28 = vld [vmem:[%s1188_s1 + $0x90] sm:$0xff]  ;;  %v42_v30 = vld [vmem:[%s1188_s1 + $0x88] sm:$0xff]  ;;  %v21_v31 = vld [vmem:[%s1187_s0] sm:$0xff] }
  0x15   :  { %v22_v32 = vld [vmem:[%s1187_s0 + $0x8] sm:$0xff]  ;;  %v25_v33 = vld [vmem:[%s1188_s1] sm:$0xff]  ;;  %v23_v35 = vmul.f32 0.17677669, %v21_v31  ;;  %v337_v46 = vld [vmem:[%s1189_s2 + $0x78] sm:$0xff] }
  0x16   :  { %647 = vmatpush3.xpose.msk.msra.mxu0 %vm61_vm0, %v35_v11  ;;  %v41_v34 = vld [vmem:[%s1188_s1 + $0x80] sm:$0xff]  ;;  %v24_v36 = vmul.f32 0.17677669, %v22_v32  ;;  %v336_v47 = vld [vmem:[%s1189_s2 + $0x70] sm:$0xff]  ;;  %v353_v48 = vld [vmem:[%s1189_s2 + $0xf8] sm:$0xff] }
  0x17   :  { %682 = vmatpush3.xpose.msk.msra.mxu1 %vm61_vm0, %v51_v12  ;;  %648 = vmatprep.subr.mxu0 %v834_v2  ;;  %v565_v37 = vld [vmem:[%s1190_s3] sm:$0xff]   ;;  %v352_v49 = vld [vmem:[%s1189_s2 + $0xf0] sm:$0xff]  ;;  %v335_v50 = vld [vmem:[%s1189_s2 + $0x68] sm:$0xff] }
  0x18   :  { %683 = vmatprep.subr.mxu1 %v834_v2  ;;  %v566_v38 = vunpack.c.l.bf16 %v565_v37  ;;  %v567_v39 = vunpack.c.h.bf16 %v565_v37  ;;  %v351_v51 = vld [vmem:[%s1189_s2 + $0xe8] sm:$0xff]  ;;  %v334_v52 = vld [vmem:[%s1189_s2 + $0x60] sm:$0xff]  ;;  %v333_v54 = vld [vmem:[%s1189_s2 + $0x58] sm:$0xff] }
  0x19   :  { %v350_v53 = vld [vmem:[%s1189_s2 + $0xe0] sm:$0xff]  ;;  %v349_v55 = vld [vmem:[%s1189_s2 + $0xd8] sm:$0xff]  ;;  %v332_v56 = vld [vmem:[%s1189_s2 + $0x50] sm:$0xff] }
  0x1a   :  { %649 = vmatpush3.xpose.msk.msra.mxu0 %vm61_vm0, %v34_v13  ;;  %v348_v57 = vld [vmem:[%s1189_s2 + $0xd0] sm:$0xff]  ;;  %v331_v58 = vld [vmem:[%s1189_s2 + $0x48] sm:$0xff]  ;;  %v330_v59 = vld [vmem:[%s1189_s2 + $0x40] sm:$0xff] }
  0x1b   :  { %684 = vmatpush3.xpose.msk.msra.mxu1 %vm61_vm0, %v50_v14  ;;  %650 = vmatprep.subr.mxu0 %v834_v2  ;;  %v329_v5 = vld [vmem:[%s1189_s2 + $0x38] sm:$0xff]  ;;  %v347_v6 = vld [vmem:[%s1189_s2 + $0xc8] sm:$0xff]  ;;  %v328_v7 = vld [vmem:[%s1189_s2 + $0x30] sm:$0xff] }
  0x1c   :  { %685 = vmatprep.subr.mxu1 %v834_v2  ;;  %v346_v8 = vld [vmem:[%s1189_s2 + $0xc0] sm:$0xff]  ;;  %v327_v9 = vld [vmem:[%s1189_s2 + $0x28] sm:$0xff]  ;;  %v345_v10 = vld [vmem:[%s1189_s2 + $0xb8] sm:$0xff] }
  0x1d   :  { %v326_v11 = vld [vmem:[%s1189_s2 + $0x20] sm:$0xff]  ;;  %v344_v12 = vld [vmem:[%s1189_s2 + $0xb0] sm:$0xff]  ;;  %v325_v13 = vld [vmem:[%s1189_s2 + $0x18] sm:$0xff] }
  0x1e   :  { %651 = vmatpush3.xpose.msk.msra.mxu0 %vm61_vm0, %v33_v15  ;;  %v343_v14 = vld [vmem:[%s1189_s2 + $0xa8] sm:$0xff]  ;;  %v324_v15 = vld [vmem:[%s1189_s2 + $0x10] sm:$0xff] }
  0x1f   :  { %686 = vmatpush3.xpose.msk.msra.mxu1 %vm61_vm0, %v49_v16  ;;  %652 = vmatprep.subr.mxu0 %v834_v2  ;;  %v342_v16 = vld [vmem:[%s1189_s2 + $0xa0] sm:$0xff] }
  0x20   :  { %687 = vmatprep.subr.mxu1 %v834_v2 }
  0x22   :  { %653 = vmatpush3.xpose.msk.msra.mxu0 %vm61_vm0, %v32_v17  ;;  %v323_v17 = vld [vmem:[%s1189_s2 + $0x8] sm:$0xff] }
  0x23   :  { %688 = vmatpush3.xpose.msk.msra.mxu1 %vm61_vm0, %v48_v18  ;;  %654 = vmatprep.subr.mxu0 %v834_v2  ;;  %v341_v18 = vld [vmem:[%s1189_s2 + $0x98] sm:$0xff] }
  0x24   :  { %689 = vmatprep.subr.mxu1 %v834_v2 }
  0x26   :  { %655 = vmatpush3.xpose.msk.msra.mxu0 %vm61_vm0, %v31_v19  ;;  %v322_v19 = vld [vmem:[%s1189_s2] sm:$0xff] }
  0x27   :  { %690 = vmatpush3.xpose.msk.msra.mxu1 %vm61_vm0, %v47_v20  ;;  %656 = vmatprep.subr.mxu0 %v834_v2  ;;  %v340_v20 = vld [vmem:[%s1189_s2 + $0x90] sm:$0xff] }
  0x28   :  { %691 = vmatprep.subr.mxu1 %v834_v2 }
  0x2a   :  { %657 = vmatpush3.xpose.msk.msra.mxu0 %vm61_vm0, %v30_v21  ;;  %v339_v21 = vld [vmem:[%s1189_s2 + $0x88] sm:$0xff] }
  0x2b   :  { %692 = vmatpush3.xpose.msk.msra.mxu1 %vm61_vm0, %v46_v22  ;;  %658 = vmatprep.subr.mxu0 %v834_v2  ;;  %v338_v22 = vld [vmem:[%s1189_s2 + $0x80] sm:$0xff]  ;;  %s790_s2 = scalar_lea.vmem %s516_s19, 256 }
  0x2c   :  { %693 = vmatprep.subr.mxu1 %v834_v2  ;;  %p791_p0 = scmp.ne.s32.totalorder %s516_s19, %s790_s2  ;;  %p796_p2 = scmp.lt.s32.totalorder %s790_s2, %s790_s2 }
  0x2e   :  { %659 = vmatpush3.xpose.msk.msra.mxu0 %vm61_vm0, %v29_v23  ;;  %p797_p3 = por %p796_p2, %p795_p1 }
  0x2f   :  { %694 = vmatpush3.xpose.msk.msra.mxu1 %vm61_vm0, %v45_v24  ;;  %660 = vmatprep.subr.mxu0 %v834_v2 }
  0x30   :  { %695 = vmatprep.subr.mxu1 %v834_v2  ;;  %p798_p4 = pnand %p797_p3, %p791_p0 }
  0x32   :  { %661 = vmatpush3.xpose.msk.msra.mxu0 %vm61_vm0, %v28_v25 }
  0x33   :  { %696 = vmatpush3.xpose.msk.msra.mxu1 %vm61_vm0, %v44_v26  ;;  %662 = vmatprep.subr.mxu0 %v834_v2 }
  0x34   :  { %697 = vmatprep.subr.mxu1 %v834_v2 }
  0x36   :  { %663 = vmatpush3.xpose.msk.msra.mxu0 %vm61_vm0, %v27_v27 }
  0x37   :  { %698 = vmatpush3.xpose.msk.msra.mxu1 %vm61_vm0, %v43_v28  ;;  %664 = vmatprep.subr.mxu0 %v834_v2 }
  0x38   :  { %699 = vmatprep.subr.mxu1 %v834_v2 }
  0x3a   :  { %665 = vmatpush3.xpose.msk.msra.mxu0 %vm61_vm0, %v26_v29 }
  0x3b   :  { %700 = vmatpush3.xpose.msk.msra.mxu1 %vm61_vm0, %v42_v30  ;;  %666 = vmatprep.subr.mxu0 %v834_v2 }
  0x3c   :  { %701 = vmatprep.subr.mxu1 %v834_v2 }
  0x3e   :  { %667 = vmatpush3.xpose.msk.msra.mxu0 %vm61_vm0, %v25_v33 }
  0x3f   :  { %702 = vmatpush3.xpose.msk.msra.mxu1 %vm61_vm0, %v41_v34  ;;  %706 = vmatprep.subr.mxu0 %v834_v2 }
  0x40   :  { %741 = vmatprep.subr.mxu1 %v834_v2 }
  0x41   :  { %669 = vmatmul.mubr.msk.f32.vlgmr.msra.gmra.mxu0 %vm61_vm0, %v23_v35 }
  0x42   :  { %704 = vmatmul.mubr.msk.f32.vlgmr.msra.gmra.mxu1 %vm61_vm0, %v24_v36  ;;  %738 = vmatprep.mubr.msk.f32.mxu0 %vm835_vm1, %v834_v2 }
  0x43   :  { %773 = vmatprep.mubr.msk.f32.mxu1 %vm835_vm1, %v834_v2  ;;  %707 = vmatpush3.msra.mxu0 %v337_v46 }
  0x44   :  { %708 = vmatprep.subr.mxu0 %v834_v2  ;;  %742 = vmatpush3.msra.mxu1 %v353_v48 }
  0x45   :  { %709 = vmatpush3.msra.mxu0 %v336_v47  ;;  %743 = vmatprep.subr.mxu1 %v834_v2 }
  0x46   :  { %710 = vmatprep.subr.mxu0 %v834_v2  ;;  %744 = vmatpush3.msra.mxu1 %v352_v49 }
  0x47   :  { %711 = vmatpush3.msra.mxu0 %v335_v50  ;;  %745 = vmatprep.subr.mxu1 %v834_v2 }
  0x48   :  { %712 = vmatprep.subr.mxu0 %v834_v2  ;;  %746 = vmatpush3.msra.mxu1 %v351_v51 }
  0x49   :  { %713 = vmatpush3.msra.mxu0 %v334_v52  ;;  %747 = vmatprep.subr.mxu1 %v834_v2 }
  0x4a   :  { %714 = vmatprep.subr.mxu0 %v834_v2  ;;  %748 = vmatpush3.msra.mxu1 %v350_v53 }
  0x4b   :  { %715 = vmatpush3.msra.mxu0 %v333_v54  ;;  %749 = vmatprep.subr.mxu1 %v834_v2 }
  0x4c   :  { %716 = vmatprep.subr.mxu0 %v834_v2  ;;  %750 = vmatpush3.msra.mxu1 %v349_v55 }
  0x4d   :  { %717 = vmatpush3.msra.mxu0 %v332_v56  ;;  %751 = vmatprep.subr.mxu1 %v834_v2 }
  0x4e   :  { %718 = vmatprep.subr.mxu0 %v834_v2  ;;  %752 = vmatpush3.msra.mxu1 %v348_v57 }
  0x4f   :  { %719 = vmatpush3.msra.mxu0 %v331_v58  ;;  %753 = vmatprep.subr.mxu1 %v834_v2 }
  0x50   :  { %720 = vmatprep.subr.mxu0 %v834_v2  ;;  %754 = vmatpush3.msra.mxu1 %v347_v6 }
  0x51   :  { %721 = vmatpush3.msra.mxu0 %v330_v59  ;;  %755 = vmatprep.subr.mxu1 %v834_v2 }
  0x52   :  { %722 = vmatprep.subr.mxu0 %v834_v2  ;;  %756 = vmatpush3.msra.mxu1 %v346_v8 }
  0x53   :  { %723 = vmatpush3.msra.mxu0 %v329_v5  ;;  %757 = vmatprep.subr.mxu1 %v834_v2 }
  0x54   :  { %724 = vmatprep.subr.mxu0 %v834_v2  ;;  %758 = vmatpush3.msra.mxu1 %v345_v10 }
  0x55   :  { %725 = vmatpush3.msra.mxu0 %v328_v7  ;;  %759 = vmatprep.subr.mxu1 %v834_v2 }
  0x56   :  { %726 = vmatprep.subr.mxu0 %v834_v2  ;;  %760 = vmatpush3.msra.mxu1 %v344_v12 }
  0x57   :  { %727 = vmatpush3.msra.mxu0 %v327_v9  ;;  %761 = vmatprep.subr.mxu1 %v834_v2 }
  0x58   :  { %728 = vmatprep.subr.mxu0 %v834_v2  ;;  %762 = vmatpush3.msra.mxu1 %v343_v14 }
  0x59   :  { %729 = vmatpush3.msra.mxu0 %v326_v11  ;;  %763 = vmatprep.subr.mxu1 %v834_v2 }
  0x5a   :  { %730 = vmatprep.subr.mxu0 %v834_v2  ;;  %764 = vmatpush3.msra.mxu1 %v342_v16 }
  0x5b   :  { %731 = vmatpush3.msra.mxu0 %v325_v13  ;;  %765 = vmatprep.subr.mxu1 %v834_v2 }
  0x5c   :  { %732 = vmatprep.subr.mxu0 %v834_v2  ;;  %766 = vmatpush3.msra.mxu1 %v341_v18 }
  0x5d   :  { %733 = vmatpush3.msra.mxu0 %v324_v15  ;;  %767 = vmatprep.subr.mxu1 %v834_v2 }
  0x5e   :  { %734 = vmatprep.subr.mxu0 %v834_v2  ;;  %768 = vmatpush3.msra.mxu1 %v340_v20 }
  0x5f   :  { %735 = vmatpush3.msra.mxu0 %v323_v17  ;;  %769 = vmatprep.subr.mxu1 %v834_v2 }
  0x60   :  { %736 = vmatprep.subr.mxu0 %v834_v2  ;;  %770 = vmatpush3.msra.mxu1 %v339_v21 }
  0x61   :  { %737 = vmatpush3.msra.mxu0 %v322_v19  ;;  %771 = vmatprep.subr.mxu1 %v834_v2 }
  0x62   :  { %772 = vmatpush3.msra.mxu1 %v338_v22 }
 0x101   :  { %v179_v40 = vpop.f32.mrf.mxu0 }
 0x102   :  { %v300_v41 = vpop.f32.mrf.mxu1  ;;  %v180_v42 = vadd.f32 %v566_v38, %v179_v40 }
 0x103   :  { %v670_v43 = vpop.f32.mrf.mxu0  ;;  %v301_v45 = vadd.f32 %v567_v39, %v300_v41 }
 0x104   :  { %v705_v44 = vpop.f32.mrf.mxu1  ;;  %304 = vmax.xlane.f32.xlu0 %v180_v42 }
 0x108   :  { %306 = vmax.xlane.f32.xlu0 %v301_v45 }
 0x18d   :  { %v305_v60 = vpop.xlane.xlu0 %304 }
 0x18e   :  { %v308_v61 = vsub.f32 %v180_v42, %v305_v60 }
 0x190   :  { %v310_v62 = vmul.f32 1.442695, %v308_v61 }
 0x191   :  { %v307_v63 = vpop.xlane.xlu0 %306 }
 0x192   :  { %782 = vpow2.f32 %v310_v62  ;;  %v309_v0 = vsub.f32 %v301_v45, %v307_v63 }
 0x194   :  { %v312_v1 = vmul.f32 1.442695, %v309_v0 }
 0x196   :  { %784 = vpow2.f32 %v312_v1 }
 0x19f   :  { %v783_v3 = vpop.eup %782 }
 0x1a0   :  { %314 = vadd.xlane.f32.xlu1 %v783_v3 }
 0x1a3   :  { %v1107_v4 = vpop.eup %784 }
 0x1a4   :  { %316 = vadd.xlane.f32.xlu1 %v1107_v4 }
 0x229   :  { %v315_v23 = vpop.xlane.xlu1 %314 }
 0x22a   :  { %786 = vrcp.f32 %v315_v23 }
 0x22d   :  { %v317_v24 = vpop.xlane.xlu1 %316 }
 0x22e   :  { %788 = vrcp.f32 %v317_v24 }
 0x237   :  { %v787_v25 = vpop.eup %786 }
 0x238   :  { %v320_v26 = vmul.f32 %v787_v25, %v783_v3 }
 0x23a   :  { %739 = vmatmul.mubr.f32.vlgmr.msra.gmra.mxu0 %v320_v26  ;;  %496 = vst [vmem:[#allocation4] sm:$0xff] %v320_v26 }
 0x23b   :  { %v789_v27 = vpop.eup %788 }
 0x23c   :  { %v321_v28 = vmul.f32 %v789_v27, %v1107_v4 }
 0x23e   :  { %774 = vmatmul.mubr.f32.vlgmr.msra.gmra.mxu1 %v321_v28  ;;  %497 = vst [vmem:[#allocation4 + $0x8] sm:$0xff] %v321_v28 }
 0x23f   :  { %801 = shalt.err (!%p798_p4)
}
 0x240   :  { %s837_s20 = smov 128   ;;  %s838_s21 = smov 8  }
 0x241   :  { %521 = dma.vmem_to_hbm [thread:$0]  %s516_s19, 256, %s1192_s5, [#allocation5], %s837_s20, %s837_s20, %s838_s21  }
 0x242   :  { %s839_s24 = smov [#allocation2]  }
 0x243   :  { %s503_s25 = sshll.u32 %s839_s24, 4  ;;  %s504_s25 = int_to_ptr.vmem [resolvable:$true] %s503_s25 }
 0x244   :  { %s810_s26 = scalar_lea.vmem %s504_s25, 256  ;;  %p815_p6 = scmp.lt.s32.totalorder %s504_s25, %s504_s25 }
 0x245   :  { %p811_p5 = scmp.ne.s32.totalorder %s504_s25, %s810_s26  ;;  %p816_p7 = scmp.lt.s32.totalorder %s810_s26, %s810_s26 }
 0x247   :  { %p817_p8 = por %p816_p7, %p815_p6 }
 0x249   :  { %p818_p9 = pnand %p817_p8, %p811_p5 }
 0x2fa   :  { %v420_v2 = vpop.f32.mrf.mxu0 }
 0x2fb   :  { %494 = vst [vmem:[#allocation2] sm:$0xff] %v420_v2 }
 0x2fc   :  { %v740_v29 = vpop.f32.mrf.mxu0 }
 0x2fe   :  { %v490_v30 = vpop.f32.mrf.mxu1 }
 0x2ff   :  { %495 = vst [vmem:[#allocation2 + $0x8] sm:$0xff] %v490_v30 }
 0x300   :  { %v775_v31 = vpop.f32.mrf.mxu1 }
 0x301   :  { %821 = shalt.err (!%p818_p9)
}
 0x302   :  { %509 = dma.vmem_to_hbm [thread:$0]  %s504_s25, 256, %s1191_s4, [#allocation3], %s837_s20, %s837_s20, %s838_s21  }
 0x303   :  { %830 = dma.done.wait [#allocation3], 256  }
 0x304   :  { %831 = vsyncadd [#allocation3], 4294967040 }
 0x305   :  { %832 = dma.done.wait [#allocation5], 256  }
 0x306   :  { %833 = vsyncadd [#allocation5], 4294967040 }
 0x307   :  { %528 = vsyncpa [#allocation3], 1 }
 0x308   :  { %529 = vsyncpa [#allocation5], 1 }

// kernel: tpu_custom_call.1
= control target key start
LH: loop header
LB: loop body
LE: loop exit
PB: predicated region body
PF: predicated region fallthrough
CT: control target
= control target key end

     0   :  { %11 = vsyncpa [#allocation3], 0  ;;  %vm61_vm0 = vcmask 261120   ;;  %v834_v2 = vmov 0.0   ;;  %vm835_vm1 = vmmov 0   ;;  %s1187_s0 = inlined_call_operand.vmem [shape: f32[2,8,32], index: 0, kind: input, shape index: {}]   ;;  %s1188_s1 = inlined_call_operand.vmem [shape: f32[2,128,32], index: 1, kind: input, shape index: {}]   ;;  %s1189_s2 = inlined_call_operand.vmem [shape: f32[2,128,128], index: 2, kind: input, shape index: {}]   ;;  %s1190_s3 = inlined_call_operand.vmem [shape: bf16[2,8,128], index: 3, kind: input, shape index: {}]   ;;  %s1191_s4 = inlined_call_operand.hbm [shape: f32[2,8,128], index: 4, kind: output, shape index: {0}]   ;;  %s1192_s5 = inlined_call_operand.hbm [shape: f32[2,8,128], index: 5, kind: output, shape index: {1}]  }
   0x1   :  { %v40_v0 = vld [vmem:[%s1188_s1 + $0x78] sm:$0xff]  ;;  %636 = vmatprep.subr.mxu0 %v834_v2  ;;  %671 = vmatprep.subr.mxu1 %v834_v2  ;;  %v39_v3 = vld [vmem:[%s1188_s1 + $0x70] sm:$0xff]  ;;  %v38_v5 = vld [vmem:[%s1188_s1 + $0x68] sm:$0xff] }
   0x2   :  { %v56_v1 = vld [vmem:[%s1188_s1 + $0xf8] sm:$0xff]  ;;  %637 = vmatpush3.xpose.msk.msra.mxu0 %vm61_vm0, %v40_v0  ;;  %v55_v4 = vld [vmem:[%s1188_s1 + $0xf0] sm:$0xff]  ;;  %668 = vmatprep.mubr.msk.f32.mxu0 %vm835_vm1, %v834_v2  ;;  %v54_v6 = vld [vmem:[%s1188_s1 + $0xe8] sm:$0xff] }
   0x3   :  { %672 = vmatpush3.xpose.msk.msra.mxu1 %vm61_vm0, %v56_v1  ;;  %638 = vmatprep.subr.mxu0 %v834_v2  ;;  %v37_v7 = vld [vmem:[%s1188_s1 + $0x60] sm:$0xff] }
   0x4   :  { %673 = vmatprep.subr.mxu1 %v834_v2  ;;  %703 = vmatprep.mubr.msk.f32.mxu1 %vm835_vm1, %v834_v2  ;;  %v53_v8 = vld [vmem:[%s1188_s1 + $0xe0] sm:$0xff] }
   0x6   :  { %639 = vmatpush3.xpose.msk.msra.mxu0 %vm61_vm0, %v39_v3 }
   0x7   :  { %674 = vmatpush3.xpose.msk.msra.mxu1 %vm61_vm0, %v55_v4  ;;  %640 = vmatprep.subr.mxu0 %v834_v2 }
   0x8   :  { %675 = vmatprep.subr.mxu1 %v834_v2 }
   0xa   :  { %641 = vmatpush3.xpose.msk.msra.mxu0 %vm61_vm0, %v38_v5 }
   0xb   :  { %676 = vmatpush3.xpose.msk.msra.mxu1 %vm61_vm0, %v54_v6  ;;  %642 = vmatprep.subr.mxu0 %v834_v2 }
   0xc   :  { %677 = vmatprep.subr.mxu1 %v834_v2 }
   0xd   :  { %12 = vsyncpa [#allocation5], 0  ;;  %v36_v9 = vld [vmem:[%s1188_s1 + $0x58] sm:$0xff]  ;;  %v35_v11 = vld [vmem:[%s1188_s1 + $0x50] sm:$0xff]  ;;  %s836_s18 = smov [#allocation4]  }
   0xe   :  { %643 = vmatpush3.xpose.msk.msra.mxu0 %vm61_vm0, %v37_v7  ;;  %v52_v10 = vld [vmem:[%s1188_s1 + $0xd8] sm:$0xff]  ;;  %v51_v12 = vld [vmem:[%s1188_s1 + $0xd0] sm:$0xff]  ;;  %v34_v13 = vld [vmem:[%s1188_s1 + $0x48] sm:$0xff]  ;;  %s515_s19 = sshll.u32 %s836_s18, 4  ;;  %s516_s19 = int_to_ptr.vmem [resolvable:$true] %s515_s19 }
   0xf   :  { %678 = vmatpush3.xpose.msk.msra.mxu1 %vm61_vm0, %v53_v8  ;;  %644 = vmatprep.subr.mxu0 %v834_v2  ;;  %v50_v14 = vld [vmem:[%s1188_s1 + $0xc8] sm:$0xff]  ;;  %v33_v15 = vld [vmem:[%s1188_s1 + $0x40] sm:$0xff]  ;;  %v32_v17 = vld [vmem:[%s1188_s1 + $0x38] sm:$0xff]  ;;  %p795_p1 = scmp.lt.s32.totalorder %s516_s19, %s516_s19 }
  0x10   :  { %679 = vmatprep.subr.mxu1 %v834_v2  ;;  %v49_v16 = vld [vmem:[%s1188_s1 + $0xc0] sm:$0xff]  ;;  %v48_v18 = vld [vmem:[%s1188_s1 + $0xb8] sm:$0xff]  ;;  %v31_v19 = vld [vmem:[%s1188_s1 + $0x30] sm:$0xff] }
  0x11   :  { %v47_v20 = vld [vmem:[%s1188_s1 + $0xb0] sm:$0xff]  ;;  %v30_v21 = vld [vmem:[%s1188_s1 + $0x28] sm:$0xff]  ;;  %v29_v23 = vld [vmem:[%s1188_s1 + $0x20] sm:$0xff] }
  0x12   :  { %645 = vmatpush3.xpose.msk.msra.mxu0 %vm61_vm0, %v36_v9  ;;  %v46_v22 = vld [vmem:[%s1188_s1 + $0xa8] sm:$0xff]  ;;  %v45_v24 = vld [vmem:[%s1188_s1 + $0xa0] sm:$0xff]  ;;  %v28_v25 = vld [vmem:[%s1188_s1 + $0x18] sm:$0xff] }
  0x13   :  { %680 = vmatpush3.xpose.msk.msra.mxu1 %vm61_vm0, %v52_v10  ;;  %646 = vmatprep.subr.mxu0 %v834_v2  ;;  %v44_v26 = vld [vmem:[%s1188_s1 + $0x98] sm:$0xff]  ;;  %v27_v27 = vld [vmem:[%s1188_s1 + $0x10] sm:$0xff]  ;;  %v26_v29 = vld [vmem:[%s1188_s1 + $0x8] sm:$0xff] }
  0x14   :  { %681 = vmatprep.subr.mxu1 %v834_v2  ;;  %v43_v28 = vld [vmem:[%s1188_s1 + $0x90] sm:$0xff]  ;;  %v42_v30 = vld [vmem:[%s1188_s1 + $0x88] sm:$0xff]  ;;  %v21_v31 = vld [vmem:[%s1187_s0] sm:$0xff] }
  0x15   :  { %v22_v32 = vld [vmem:[%s1187_s0 + $0x8] sm:$0xff]  ;;  %v25_v33 = vld [vmem:[%s1188_s1] sm:$0xff]  ;;  %v23_v35 = vmul.f32 0.17677669, %v21_v31  ;;  %v337_v46 = vld [vmem:[%s1189_s2 + $0x78] sm:$0xff] }
  0x16   :  { %647 = vmatpush3.xpose.msk.msra.mxu0 %vm61_vm0, %v35_v11  ;;  %v41_v34 = vld [vmem:[%s1188_s1 + $0x80] sm:$0xff]  ;;  %v24_v36 = vmul.f32 0.17677669, %v22_v32  ;;  %v336_v47 = vld [vmem:[%s1189_s2 + $0x70] sm:$0xff]  ;;  %v353_v48 = vld [vmem:[%s1189_s2 + $0xf8] sm:$0xff] }
  0x17   :  { %682 = vmatpush3.xpose.msk.msra.mxu1 %vm61_vm0, %v51_v12  ;;  %648 = vmatprep.subr.mxu0 %v834_v2  ;;  %v565_v37 = vld [vmem:[%s1190_s3] sm:$0xff]   ;;  %v352_v49 = vld [vmem:[%s1189_s2 + $0xf0] sm:$0xff]  ;;  %v335_v50 = vld [vmem:[%s1189_s2 + $0x68] sm:$0xff] }
  0x18   :  { %683 = vmatprep.subr.mxu1 %v834_v2  ;;  %v566_v38 = vunpack.c.l.bf16 %v565_v37  ;;  %v567_v39 = vunpack.c.h.bf16 %v565_v37  ;;  %v351_v51 = vld [vmem:[%s1189_s2 + $0xe8] sm:$0xff]  ;;  %v334_v52 = vld [vmem:[%s1189_s2 + $0x60] sm:$0xff]  ;;  %v333_v54 = vld [vmem:[%s1189_s2 + $0x58] sm:$0xff] }
  0x19   :  { %v350_v53 = vld [vmem:[%s1189_s2 + $0xe0] sm:$0xff]  ;;  %v349_v55 = vld [vmem:[%s1189_s2 + $0xd8] sm:$0xff]  ;;  %v332_v56 = vld [vmem:[%s1189_s2 + $0x50] sm:$0xff] }
  0x1a   :  { %649 = vmatpush3.xpose.msk.msra.mxu0 %vm61_vm0, %v34_v13  ;;  %v348_v57 = vld [vmem:[%s1189_s2 + $0xd0] sm:$0xff]  ;;  %v331_v58 = vld [vmem:[%s1189_s2 + $0x48] sm:$0xff]  ;;  %v330_v59 = vld [vmem:[%s1189_s2 + $0x40] sm:$0xff] }
  0x1b   :  { %684 = vmatpush3.xpose.msk.msra.mxu1 %vm61_vm0, %v50_v14  ;;  %650 = vmatprep.subr.mxu0 %v834_v2  ;;  %v329_v5 = vld [vmem:[%s1189_s2 + $0x38] sm:$0xff]  ;;  %v347_v6 = vld [vmem:[%s1189_s2 + $0xc8] sm:$0xff]  ;;  %v328_v7 = vld [vmem:[%s1189_s2 + $0x30] sm:$0xff] }
  0x1c   :  { %685 = vmatprep.subr.mxu1 %v834_v2  ;;  %v346_v8 = vld [vmem:[%s1189_s2 + $0xc0] sm:$0xff]  ;;  %v327_v9 = vld [vmem:[%s1189_s2 + $0x28] sm:$0xff]  ;;  %v345_v10 = vld [vmem:[%s1189_s2 + $0xb8] sm:$0xff] }
  0x1d   :  { %v326_v11 = vld [vmem:[%s1189_s2 + $0x20] sm:$0xff]  ;;  %v344_v12 = vld [vmem:[%s1189_s2 + $0xb0] sm:$0xff]  ;;  %v325_v13 = vld [vmem:[%s1189_s2 + $0x18] sm:$0xff] }
  0x1e   :  { %651 = vmatpush3.xpose.msk.msra.mxu0 %vm61_vm0, %v33_v15  ;;  %v343_v14 = vld [vmem:[%s1189_s2 + $0xa8] sm:$0xff]  ;;  %v324_v15 = vld [vmem:[%s1189_s2 + $0x10] sm:$0xff] }
  0x1f   :  { %686 = vmatpush3.xpose.msk.msra.mxu1 %vm61_vm0, %v49_v16  ;;  %652 = vmatprep.subr.mxu0 %v834_v2  ;;  %v342_v16 = vld [vmem:[%s1189_s2 + $0xa0] sm:$0xff] }
  0x20   :  { %687 = vmatprep.subr.mxu1 %v834_v2 }
  0x22   :  { %653 = vmatpush3.xpose.msk.msra.mxu0 %vm61_vm0, %v32_v17  ;;  %v323_v17 = vld [vmem:[%s1189_s2 + $0x8] sm:$0xff] }
  0x23   :  { %688 = vmatpush3.xpose.msk.msra.mxu1 %vm61_vm0, %v48_v18  ;;  %654 = vmatprep.subr.mxu0 %v834_v2  ;;  %v341_v18 = vld [vmem:[%s1189_s2 + $0x98] sm:$0xff] }
  0x24   :  { %689 = vmatprep.subr.mxu1 %v834_v2 }
  0x26   :  { %655 = vmatpush3.xpose.msk.msra.mxu0 %vm61_vm0, %v31_v19  ;;  %v322_v19 = vld [vmem:[%s1189_s2] sm:$0xff] }
  0x27   :  { %690 = vmatpush3.xpose.msk.msra.mxu1 %vm61_vm0, %v47_v20  ;;  %656 = vmatprep.subr.mxu0 %v834_v2  ;;  %v340_v20 = vld [vmem:[%s1189_s2 + $0x90] sm:$0xff] }
  0x28   :  { %691 = vmatprep.subr.mxu1 %v834_v2 }
  0x2a   :  { %657 = vmatpush3.xpose.msk.msra.mxu0 %vm61_vm0, %v30_v21  ;;  %v339_v21 = vld [vmem:[%s1189_s2 + $0x88] sm:$0xff] }
  0x2b   :  { %692 = vmatpush3.xpose.msk.msra.mxu1 %vm61_vm0, %v46_v22  ;;  %658 = vmatprep.subr.mxu0 %v834_v2  ;;  %v338_v22 = vld [vmem:[%s1189_s2 + $0x80] sm:$0xff]  ;;  %s790_s2 = scalar_lea.vmem %s516_s19, 256 }
  0x2c   :  { %693 = vmatprep.subr.mxu1 %v834_v2  ;;  %p791_p0 = scmp.ne.s32.totalorder %s516_s19, %s790_s2  ;;  %p796_p2 = scmp.lt.s32.totalorder %s790_s2, %s790_s2 }
  0x2e   :  { %659 = vmatpush3.xpose.msk.msra.mxu0 %vm61_vm0, %v29_v23  ;;  %p797_p3 = por %p796_p2, %p795_p1 }
  0x2f   :  { %694 = vmatpush3.xpose.msk.msra.mxu1 %vm61_vm0, %v45_v24  ;;  %660 = vmatprep.subr.mxu0 %v834_v2 }
  0x30   :  { %695 = vmatprep.subr.mxu1 %v834_v2  ;;  %p798_p4 = pnand %p797_p3, %p791_p0 }
  0x32   :  { %661 = vmatpush3.xpose.msk.msra.mxu0 %vm61_vm0, %v28_v25 }
  0x33   :  { %696 = vmatpush3.xpose.msk.msra.mxu1 %vm61_vm0, %v44_v26  ;;  %662 = vmatprep.subr.mxu0 %v834_v2 }
  0x34   :  { %697 = vmatprep.subr.mxu1 %v834_v2 }
  0x36   :  { %663 = vmatpush3.xpose.msk.msra.mxu0 %vm61_vm0, %v27_v27 }
  0x37   :  { %698 = vmatpush3.xpose.msk.msra.mxu1 %vm61_vm0, %v43_v28  ;;  %664 = vmatprep.subr.mxu0 %v834_v2 }
  0x38   :  { %699 = vmatprep.subr.mxu1 %v834_v2 }
  0x3a   :  { %665 = vmatpush3.xpose.msk.msra.mxu0 %vm61_vm0, %v26_v29 }
  0x3b   :  { %700 = vmatpush3.xpose.msk.msra.mxu1 %vm61_vm0, %v42_v30  ;;  %666 = vmatprep.subr.mxu0 %v834_v2 }
  0x3c   :  { %701 = vmatprep.subr.mxu1 %v834_v2 }
  0x3e   :  { %667 = vmatpush3.xpose.msk.msra.mxu0 %vm61_vm0, %v25_v33 }
  0x3f   :  { %702 = vmatpush3.xpose.msk.msra.mxu1 %vm61_vm0, %v41_v34  ;;  %706 = vmatprep.subr.mxu0 %v834_v2 }
  0x40   :  { %741 = vmatprep.subr.mxu1 %v834_v2 }
  0x41   :  { %669 = vmatmul.mubr.msk.f32.vlgmr.msra.gmra.mxu0 %vm61_vm0, %v23_v35 }
  0x42   :  { %704 = vmatmul.mubr.msk.f32.vlgmr.msra.gmra.mxu1 %vm61_vm0, %v24_v36  ;;  %738 = vmatprep.mubr.msk.f32.mxu0 %vm835_vm1, %v834_v2 }
  0x43   :  { %773 = vmatprep.mubr.msk.f32.mxu1 %vm835_vm1, %v834_v2  ;;  %707 = vmatpush3.msra.mxu0 %v337_v46 }
  0x44   :  { %708 = vmatprep.subr.mxu0 %v834_v2  ;;  %742 = vmatpush3.msra.mxu1 %v353_v48 }
  0x45   :  { %709 = vmatpush3.msra.mxu0 %v336_v47  ;;  %743 = vmatprep.subr.mxu1 %v834_v2 }
  0x46   :  { %710 = vmatprep.subr.mxu0 %v834_v2  ;;  %744 = vmatpush3.msra.mxu1 %v352_v49 }
  0x47   :  { %711 = vmatpush3.msra.mxu0 %v335_v50  ;;  %745 = vmatprep.subr.mxu1 %v834_v2 }
  0x48   :  { %712 = vmatprep.subr.mxu0 %v834_v2  ;;  %746 = vmatpush3.msra.mxu1 %v351_v51 }
  0x49   :  { %713 = vmatpush3.msra.mxu0 %v334_v52  ;;  %747 = vmatprep.subr.mxu1 %v834_v2 }
  0x4a   :  { %714 = vmatprep.subr.mxu0 %v834_v2  ;;  %748 = vmatpush3.msra.mxu1 %v350_v53 }
  0x4b   :  { %715 = vmatpush3.msra.mxu0 %v333_v54  ;;  %749 = vmatprep.subr.mxu1 %v834_v2 }
  0x4c   :  { %716 = vmatprep.subr.mxu0 %v834_v2  ;;  %750 = vmatpush3.msra.mxu1 %v349_v55 }
  0x4d   :  { %717 = vmatpush3.msra.mxu0 %v332_v56  ;;  %751 = vmatprep.subr.mxu1 %v834_v2 }
  0x4e   :  { %718 = vmatprep.subr.mxu0 %v834_v2  ;;  %752 = vmatpush3.msra.mxu1 %v348_v57 }
  0x4f   :  { %719 = vmatpush3.msra.mxu0 %v331_v58  ;;  %753 = vmatprep.subr.mxu1 %v834_v2 }
  0x50   :  { %720 = vmatprep.subr.mxu0 %v834_v2  ;;  %754 = vmatpush3.msra.mxu1 %v347_v6 }
  0x51   :  { %721 = vmatpush3.msra.mxu0 %v330_v59  ;;  %755 = vmatprep.subr.mxu1 %v834_v2 }
  0x52   :  { %722 = vmatprep.subr.mxu0 %v834_v2  ;;  %756 = vmatpush3.msra.mxu1 %v346_v8 }
  0x53   :  { %723 = vmatpush3.msra.mxu0 %v329_v5  ;;  %757 = vmatprep.subr.mxu1 %v834_v2 }
  0x54   :  { %724 = vmatprep.subr.mxu0 %v834_v2  ;;  %758 = vmatpush3.msra.mxu1 %v345_v10 }
  0x55   :  { %725 = vmatpush3.msra.mxu0 %v328_v7  ;;  %759 = vmatprep.subr.mxu1 %v834_v2 }
  0x56   :  { %726 = vmatprep.subr.mxu0 %v834_v2  ;;  %760 = vmatpush3.msra.mxu1 %v344_v12 }
  0x57   :  { %727 = vmatpush3.msra.mxu0 %v327_v9  ;;  %761 = vmatprep.subr.mxu1 %v834_v2 }
  0x58   :  { %728 = vmatprep.subr.mxu0 %v834_v2  ;;  %762 = vmatpush3.msra.mxu1 %v343_v14 }
  0x59   :  { %729 = vmatpush3.msra.mxu0 %v326_v11  ;;  %763 = vmatprep.subr.mxu1 %v834_v2 }
  0x5a   :  { %730 = vmatprep.subr.mxu0 %v834_v2  ;;  %764 = vmatpush3.msra.mxu1 %v342_v16 }
  0x5b   :  { %731 = vmatpush3.msra.mxu0 %v325_v13  ;;  %765 = vmatprep.subr.mxu1 %v834_v2 }
  0x5c   :  { %732 = vmatprep.subr.mxu0 %v834_v2  ;;  %766 = vmatpush3.msra.mxu1 %v341_v18 }
  0x5d   :  { %733 = vmatpush3.msra.mxu0 %v324_v15  ;;  %767 = vmatprep.subr.mxu1 %v834_v2 }
  0x5e   :  { %734 = vmatprep.subr.mxu0 %v834_v2  ;;  %768 = vmatpush3.msra.mxu1 %v340_v20 }
  0x5f   :  { %735 = vmatpush3.msra.mxu0 %v323_v17  ;;  %769 = vmatprep.subr.mxu1 %v834_v2 }
  0x60   :  { %736 = vmatprep.subr.mxu0 %v834_v2  ;;  %770 = vmatpush3.msra.mxu1 %v339_v21 }
  0x61   :  { %737 = vmatpush3.msra.mxu0 %v322_v19  ;;  %771 = vmatprep.subr.mxu1 %v834_v2 }
  0x62   :  { %772 = vmatpush3.msra.mxu1 %v338_v22 }
 0x101   :  { %v179_v40 = vpop.f32.mrf.mxu0 }
 0x102   :  { %v300_v41 = vpop.f32.mrf.mxu1  ;;  %v180_v42 = vadd.f32 %v566_v38, %v179_v40 }
 0x103   :  { %v670_v43 = vpop.f32.mrf.mxu0  ;;  %v301_v45 = vadd.f32 %v567_v39, %v300_v41 }
 0x104   :  { %v705_v44 = vpop.f32.mrf.mxu1  ;;  %304 = vmax.xlane.f32.xlu0 %v180_v42 }
 0x108   :  { %306 = vmax.xlane.f32.xlu0 %v301_v45 }
 0x18d   :  { %v305_v60 = vpop.xlane.xlu0 %304 }
 0x18e   :  { %v308_v61 = vsub.f32 %v180_v42, %v305_v60 }
 0x190   :  { %v310_v62 = vmul.f32 1.442695, %v308_v61 }
 0x191   :  { %v307_v63 = vpop.xlane.xlu0 %306 }
 0x192   :  { %782 = vpow2.f32 %v310_v62  ;;  %v309_v0 = vsub.f32 %v301_v45, %v307_v63 }
 0x194   :  { %v312_v1 = vmul.f32 1.442695, %v309_v0 }
 0x196   :  { %784 = vpow2.f32 %v312_v1 }
 0x19f   :  { %v783_v3 = vpop.eup %782 }
 0x1a0   :  { %314 = vadd.xlane.f32.xlu1 %v783_v3 }
 0x1a3   :  { %v1107_v4 = vpop.eup %784 }
 0x1a4   :  { %316 = vadd.xlane.f32.xlu1 %v1107_v4 }
 0x229   :  { %v315_v23 = vpop.xlane.xlu1 %314 }
 0x22a   :  { %786 = vrcp.f32 %v315_v23 }
 0x22d   :  { %v317_v24 = vpop.xlane.xlu1 %316 }
 0x22e   :  { %788 = vrcp.f32 %v317_v24 }
 0x237   :  { %v787_v25 = vpop.eup %786 }
 0x238   :  { %v320_v26 = vmul.f32 %v787_v25, %v783_v3 }
 0x23a   :  { %739 = vmatmul.mubr.f32.vlgmr.msra.gmra.mxu0 %v320_v26  ;;  %496 = vst [vmem:[#allocation4] sm:$0xff] %v320_v26 }
 0x23b   :  { %v789_v27 = vpop.eup %788 }
 0x23c   :  { %v321_v28 = vmul.f32 %v789_v27, %v1107_v4 }
 0x23e   :  { %774 = vmatmul.mubr.f32.vlgmr.msra.gmra.mxu1 %v321_v28  ;;  %497 = vst [vmem:[#allocation4 + $0x8] sm:$0xff] %v321_v28 }
 0x23f   :  { %801 = shalt.err (!%p798_p4)
}
 0x240   :  { %s837_s20 = smov 128   ;;  %s838_s21 = smov 8  }
 0x241   :  { %521 = dma.vmem_to_hbm [thread:$0]  %s516_s19, 256, %s1192_s5, [#allocation5], %s837_s20, %s837_s20, %s838_s21  }
 0x242   :  { %s839_s24 = smov [#allocation2]  }
 0x243   :  { %s503_s25 = sshll.u32 %s839_s24, 4  ;;  %s504_s25 = int_to_ptr.vmem [resolvable:$true] %s503_s25 }
 0x244   :  { %s810_s26 = scalar_lea.vmem %s504_s25, 256  ;;  %p815_p6 = scmp.lt.s32.totalorder %s504_s25, %s504_s25 }
 0x245   :  { %p811_p5 = scmp.ne.s32.totalorder %s504_s25, %s810_s26  ;;  %p816_p7 = scmp.lt.s32.totalorder %s810_s26, %s810_s26 }
 0x247   :  { %p817_p8 = por %p816_p7, %p815_p6 }
 0x249   :  { %p818_p9 = pnand %p817_p8, %p811_p5 }
 0x2fa   :  { %v420_v2 = vpop.f32.mrf.mxu0 }
 0x2fb   :  { %494 = vst [vmem:[#allocation2] sm:$0xff] %v420_v2 }
 0x2fc   :  { %v740_v29 = vpop.f32.mrf.mxu0 }
 0x2fe   :  { %v490_v30 = vpop.f32.mrf.mxu1 }
 0x2ff   :  { %495 = vst [vmem:[#allocation2 + $0x8] sm:$0xff] %v490_v30 }
 0x300   :  { %v775_v31 = vpop.f32.mrf.mxu1 }
 0x301   :  { %821 = shalt.err (!%p818_p9)
}
 0x302   :  { %509 = dma.vmem_to_hbm [thread:$0]  %s504_s25, 256, %s1191_s4, [#allocation3], %s837_s20, %s837_s20, %s838_s21  }
 0x303   :  { %830 = dma.done.wait [#allocation3], 256  }
 0x304   :  { %831 = vsyncadd [#allocation3], 4294967040 }
 0x305   :  { %832 = dma.done.wait [#allocation5], 256  }
 0x306   :  { %833 = vsyncadd [#allocation5], 4294967040 }
 0x307   :  { %528 = vsyncpa [#allocation3], 1 }
 0x308   :  { %529 = vsyncpa [#allocation5], 1 }

</bundles_post_ra>
